<compile_context>
chip_gen: v5e
topology: v5e:2x2
jax: 0.10.0
libtpu: 0.0.40
codegen_flags: <defaults>
</compile_context>

<pallas_src>
import functools
import math

import numpy as np
import jax
import jax.numpy as jnp
from jax import lax
from jax.experimental import pallas as pl
from jax.experimental.pallas import tpu as pltpu

_VMEM_LIMIT = 64 * 1024 * 1024


def _pick_tile(dim, desired, align):
    """Largest tile <= desired that divides dim and respects TPU alignment.

    Falls back to the full dimension (always legal for BlockSpec)."""
    if dim <= desired:
        return dim
    if dim % desired == 0:
        return desired
    for t in range(desired, align - 1, -align):
        if dim % t == 0:
            return t
    return dim


# ----------------------------------------------------------------------------
# Tiled linear kernels: y = x @ W^T + b   (W already transposed to (Ein, Eout))
# ----------------------------------------------------------------------------
def _linear_kernel_inplace(x_ref, wt_ref, b_ref, o_ref):
    """f32 output: accumulate directly into the resident output block."""
    k = pl.program_id(2)

    @pl.when(k == 0)
    def _():
        o_ref[...] = jnp.zeros_like(o_ref)

    o_ref[...] += jnp.dot(x_ref[...], wt_ref[...],
                          preferred_element_type=jnp.float32)

    @pl.when(k == pl.num_programs(2) - 1)
    def _():
        o_ref[...] += b_ref[...].astype(o_ref.dtype)


def _linear_kernel_acc(x_ref, wt_ref, b_ref, o_ref, acc_ref):
    """Narrow (e.g. bf16) output: keep the f32 accumulator in VMEM scratch."""
    k = pl.program_id(2)

    @pl.when(k == 0)
    def _():
        acc_ref[...] = jnp.zeros_like(acc_ref)

    acc_ref[...] += jnp.dot(x_ref[...], wt_ref[...],
                            preferred_element_type=jnp.float32)

    @pl.when(k == pl.num_programs(2) - 1)
    def _():
        o_ref[...] = (acc_ref[...] + b_ref[...]).astype(o_ref.dtype)


def linear_tiled(x2d, wt, b2, *, out_dtype=None, tm=512, tn=256, tk=512):
    """x2d: (M, Ein); wt: (Ein, Eout) pre-transposed; b2: (1, Eout) f32."""
    M, Ein = x2d.shape
    Eout = wt.shape[1]
    out_dtype = np.dtype(out_dtype) if out_dtype is not None else np.dtype(np.float32)
    x2d = x2d.astype(wt.dtype)                      # bf16-in-HBM path: one cast
    tm = _pick_tile(M, tm, 8)
    tn = _pick_tile(Eout, tn, 128)
    tk = _pick_tile(Ein, tk, 128)
    grid = (M // tm, Eout // tn, Ein // tk)

    in_specs = [
        pl.BlockSpec((tm, tk), lambda i, j, k: (i, k)),
        pl.BlockSpec((tk, tn), lambda i, j, k: (k, j)),
        pl.BlockSpec((1, tn), lambda i, j, k: (0, j)),
    ]
    out_specs = pl.BlockSpec((tm, tn), lambda i, j, k: (i, j))

    if out_dtype == np.dtype(np.float32):
        kernel = _linear_kernel_inplace
        scratch = []
    else:
        kernel = _linear_kernel_acc
        scratch = [pltpu.VMEM((tm, tn), jnp.float32)]

    return pl.pallas_call(
        kernel,
        out_shape=jax.ShapeDtypeStruct((M, Eout), out_dtype),
        grid_spec=pltpu.PrefetchScalarGridSpec(
            num_scalar_prefetch=0,
            grid=grid,
            in_specs=in_specs,
            out_specs=out_specs,
            scratch_shapes=scratch,
        ),
        compiler_params=pltpu.CompilerParams(
            dimension_semantics=("parallel", "parallel", "arbitrary"),
            vmem_limit_bytes=_VMEM_LIMIT,
        ),
    )(x2d, wt, b2)


# ----------------------------------------------------------------------------
# Flash-style attention: grid = (N, H, Lq/tq, Lk/tk), online softmax over Lk.
# ----------------------------------------------------------------------------
def _flash_attn_kernel(q_ref, k_ref, v_ref, m_ref, o_ref,
                       m_sc, l_sc, acc_sc, *, scale, approx_recip):
    kj = pl.program_id(3)

    @pl.when(kj == 0)
    def _():
        m_sc[...] = jnp.full_like(m_sc, -jnp.inf)
        l_sc[...] = jnp.zeros_like(l_sc)
        acc_sc[...] = jnp.zeros_like(acc_sc)

    q = q_ref[0, 0]                        # (tq, D)  compute dtype
    k = k_ref[0, 0]                        # (tk, D)
    v = v_ref[0, 0]                        # (tk, D)
    bias = m_ref[0, 0]                     # (tq, tk) additive f32 (0 / -1e20)

    # scale folded into q: O(tq*D) multiply instead of O(tq*tk)
    qs = q * scale
    # contract the D axes directly (no explicit K transpose / XLU relayout)
    s = lax.dot_general(qs, k, (((1,), (1,)), ((), ())),
                        preferred_element_type=jnp.float32)       # (tq, tk)
    s = s + bias                           # masked entries saturate to -1e20

    m_prev = m_sc[...]
    m_new = jnp.maximum(m_prev, jnp.max(s, axis=-1, keepdims=True))
    alpha = jnp.exp(m_prev - m_new)
    p = jnp.exp(s - m_new)
    l_sc[...] = alpha * l_sc[...] + jnp.sum(p, axis=-1, keepdims=True)
    acc_sc[...] = alpha * acc_sc[...] + jnp.dot(
        p.astype(v.dtype), v, preferred_element_type=jnp.float32)
    m_sc[...] = m_new

    @pl.when(kj == pl.num_programs(3) - 1)
    def _():
        inv = pl.reciprocal(l_sc[...], approx=approx_recip)
        o_ref[0, 0] = (acc_sc[...] * inv).astype(o_ref.dtype)


def flash_attention(q4, k4, v4, mask_add, embed_size, *,
                    out_dtype=None, tq=256, tk=512):
    """q4: (N,H,Lq,D); k4/v4: (N,H,Lk,D); mask_add: (Nm,Hm,Lq,Lk) additive f32
    with Nm in {1,N}, Hm in {1,H} (no HBM broadcast over batch/head)."""
    N, H, Lq, D = q4.shape
    Lk = k4.shape[2]
    Nm, Hm = mask_add.shape[0], mask_add.shape[1]
    tq = _pick_tile(Lq, tq, 8)
    tk = _pick_tile(Lk, tk, 128)
    scale = 1.0 / math.sqrt(float(embed_size))
    approx = np.dtype(q4.dtype) != np.dtype(np.float32)
    out_dtype = out_dtype if out_dtype is not None else q4.dtype

    kernel = functools.partial(_flash_attn_kernel, scale=scale,
                               approx_recip=approx)

    q_idx = lambda n, h, qi, kj: (n, h, qi, 0)
    kv_idx = lambda n, h, qi, kj: (n, h, kj, 0)
    m_idx = lambda n, h, qi, kj: (n if Nm > 1 else 0, h if Hm > 1 else 0, qi, kj)

    return pl.pallas_call(
        kernel,
        out_shape=jax.ShapeDtypeStruct((N, H, Lq, D), out_dtype),
        grid_spec=pltpu.PrefetchScalarGridSpec(
            num_scalar_prefetch=0,
            grid=(N, H, Lq // tq, Lk // tk),
            in_specs=[
                pl.BlockSpec((1, 1, tq, D), q_idx),
                pl.BlockSpec((1, 1, tk, D), kv_idx),
                pl.BlockSpec((1, 1, tk, D), kv_idx),
                pl.BlockSpec((1, 1, tq, tk), m_idx),
            ],
            out_specs=pl.BlockSpec((1, 1, tq, D), q_idx),
            scratch_shapes=[
                pltpu.VMEM((tq, 1), jnp.float32),    # running max
                pltpu.VMEM((tq, 1), jnp.float32),    # running sum
                pltpu.VMEM((tq, D), jnp.float32),    # f32 accumulator
            ],
        ),
        compiler_params=pltpu.CompilerParams(
            dimension_semantics=("parallel", "parallel", "parallel", "arbitrary"),
            vmem_limit_bytes=_VMEM_LIMIT,
        ),
    )(q4, k4, v4, mask_add)


# ----------------------------------------------------------------------------
# Parameter preparation (one-time: transpose + cast weights, f32 biases)
# ----------------------------------------------------------------------------
def prepare_params(params, compute_dtype=jnp.bfloat16):
    wt = lambda w: jnp.transpose(w).astype(compute_dtype)   # (Ein, Eout)
    bb = lambda b: b.reshape(1, -1).astype(jnp.float32)
    return {
        "wt_v": wt(params["w_v"]), "b_v": bb(params["b_v"]),
        "wt_k": wt(params["w_k"]), "b_k": bb(params["b_k"]),
        "wt_q": wt(params["w_q"]), "b_q": bb(params["b_q"]),
        "wt_o": wt(params["w_o"]), "b_o": bb(params["b_o"]),
    }


def _additive_mask(mask, N, H, Lq, Lk):
    """Additive f32 mask (0 unmasked / -1e20 masked), shape (Nm,Hm,Lq,Lk) with
    Nm in {1,N}, Hm in {1,H}.  Never broadcast over N*H in HBM."""
    if mask is None:
        return jnp.zeros((1, 1, Lq, Lk), jnp.float32)
    m = jnp.asarray(mask)
    if m.ndim == 2:
        m = m[None, None]                      # (Lq, Lk)    -> (1, 1, Lq, Lk)
    elif m.ndim == 3:
        m = m[:, None]                         # (N, Lq, Lk) -> (N, 1, Lq, Lk)
    elif m.ndim != 4:
        raise ValueError("mask must have 2, 3 or 4 dims")
    assert m.shape[0] in (1, N) and m.shape[1] in (1, H), \
        f"mask batch/head dims {m.shape[:2]} must be 1 or ({N},{H})"
    m = jnp.broadcast_to(m, m.shape[:2] + (Lq, Lk))
    return jnp.where(m == 0, jnp.float32(-1e20), jnp.float32(0.0))


# ----------------------------------------------------------------------------
# Full SelfAttention forward (matches the PyTorch module's direct reshapes)
# ----------------------------------------------------------------------------
def self_attention_forward(prep, values, keys, query, mask, embed_size, num_heads):
    cdt = prep["wt_q"].dtype                   # compute dtype (f32 or bf16)
    N, Lv, E = values.shape
    Lk = keys.shape[1]
    Lq = query.shape[1]
    H = num_heads
    D = embed_size // num_heads
    assert Lv == Lk, "key/value lengths must match (as in the PyTorch module)"

    # Three independent tiled projections: no fused-output slicing, outputs in
    # the compute dtype (bf16 on the fast path) to halve writeback + next DMA.
    v_proj = linear_tiled(values.reshape(N * Lv, E), prep["wt_v"], prep["b_v"],
                          out_dtype=cdt)
    k_proj = linear_tiled(keys.reshape(N * Lk, E), prep["wt_k"], prep["b_k"],
                          out_dtype=cdt)
    q_proj = linear_tiled(query.reshape(N * Lq, E), prep["wt_q"], prep["b_q"],
                          out_dtype=cdt)

    # PyTorch's *direct* row-major reshape (N, L, E) -> (N, H, L, D):
    # a contiguous reinterpretation, i.e. free (no copy).
    v4 = v_proj.reshape(N, H, Lv, D)
    k4 = k_proj.reshape(N, H, Lk, D)
    q4 = q_proj.reshape(N, H, Lq, D)

    mask_add = _additive_mask(mask, N, H, Lq, Lk)

    attn = flash_attention(q4, k4, v4, mask_add, embed_size, out_dtype=cdt)

    # Direct reshape (N, H, Lq, D) -> (N*Lq, H*D): contiguous, free, exactly
    # what torch's attention.reshape(N, Lq, H*D) does.
    out2d = attn.reshape(N * Lq, H * D)
    out = linear_tiled(out2d, prep["wt_o"], prep["b_o"], out_dtype=jnp.float32)
    return out.reshape(N, Lq, E)


# ----------------------------------------------------------------------------
# Parameter init (deterministic, mimics nn.Linear default uniform init)
# ----------------------------------------------------------------------------
def init_params(key, embed_size):
    bound = 1.0 / math.sqrt(embed_size)
    ks = jax.random.split(key, 8)
    u = lambda k, shape: jax.random.uniform(k, shape, jnp.float32, -bound, bound)
    return {
        "w_v": u(ks[0], (embed_size, embed_size)), "b_v": u(ks[1], (embed_size,)),
        "w_k": u(ks[2], (embed_size, embed_size)), "b_k": u(ks[3], (embed_size,)),
        "w_q": u(ks[4], (embed_size, embed_size)), "b_q": u(ks[5], (embed_size,)),
        "w_o": u(ks[6], (embed_size, embed_size)), "b_o": u(ks[7], (embed_size,)),
    }


# ----------------------------------------------------------------------------
# Pure-JAX reference (mirrors the PyTorch forward exactly) for verification
# ----------------------------------------------------------------------------
def reference_forward(params, values, keys, query, mask, embed_size, num_heads):
    N, Lq, E = query.shape
    D = embed_size // num_heads
    lin = lambda x, w, b: x @ w.T + b
    v = lin(values, params["w_v"], params["b_v"]).reshape(N, num_heads, -1, D)
    k = lin(keys, params["w_k"], params["b_k"]).reshape(N, num_heads, -1, D)
    q = lin(query, params["w_q"], params["b_q"]).reshape(N, num_heads, -1, D)
    scores = jnp.einsum("nhqd,nhkd->nhqk", q, k)
    scores = jnp.where(mask == 0, jnp.float32(-1e20), scores)
    p = jax.nn.softmax(scores / jnp.sqrt(jnp.float32(embed_size)), axis=3)
    attn = jnp.einsum("nhqk,nhkd->nhqd", p, v)
    out = attn.reshape(N, Lq, embed_size)
    return lin(out, params["w_o"], params["b_o"])


if __name__ == "__main__":
    embed_size = 32
    num_heads = 4
    N, L = 2, 8

    key = jax.random.PRNGKey(0)
    k_p, k_x, k_v, k_k, k_q = jax.random.split(key, 5)

    params = init_params(k_p, embed_size)
    prep_f32 = prepare_params(params, compute_dtype=jnp.float32)
    prep_bf16 = prepare_params(params, compute_dtype=jnp.bfloat16)

    fwd = jax.jit(self_attention_forward, static_argnums=(5, 6))

    # causal mask, deliberately UN-broadcast: (1, 1, L, L)
    mask = jnp.tril(jnp.ones((L, L), jnp.int32)).reshape(1, 1, L, L)

    x = jax.random.normal(k_x, (N, L, embed_size), jnp.float32)
    values = jax.random.normal(k_v, (N, L, embed_size), jnp.float32)
    keys = jax.random.normal(k_k, (N, L, embed_size), jnp.float32)
    query = jax.random.normal(k_q, (N, L, embed_size), jnp.float32)

    # --- case 1: self-attention, f32 end-to-end (tight reference check) ------
    out = jax.block_until_ready(
        fwd(prep_f32, x, x, x, mask, embed_size, num_heads))
    ref = reference_forward(params, x, x, x, mask, embed_size, num_heads)
    assert out.shape == (N, L, embed_size)
    assert jnp.allclose(out, ref, rtol=1e-5, atol=1e-5), \
        "f32 self-attention mismatch vs reference"

    # --- case 2: distinct values/keys/query, f32 -----------------------------
    out2 = jax.block_until_ready(
        fwd(prep_f32, values, keys, query, mask, embed_size, num_heads))
    ref2 = reference_forward(params, values, keys, query, mask,
                             embed_size, num_heads)
    assert out2.shape == (N, L, embed_size)
    assert jnp.allclose(out2, ref2, rtol=1e-5, atol=1e-5), \
        "f32 cross-attention mismatch vs reference"

    # --- case 3: bf16-in-HBM fast path (relaxed tolerance: bf16 rounding) ----
    out3 = jax.block_until_ready(
        fwd(prep_bf16, x, x, x, mask, embed_size, num_heads))
    assert out3.shape == (N, L, embed_size)
    assert bool(jnp.all(jnp.isfinite(out3)))
    assert jnp.allclose(out3, ref, rtol=1e-1, atol=1e-1), \
        "bf16 path diverged from reference"

    print("KERNEL_OK")
</pallas_src>

<mosaic_0001>
module attributes {stable_mosaic.version = 11 : i64} {
  func.func @_linear_kernel_inplace(%arg0: i32, %arg1: i32, %arg2: i32, %arg3: memref<16x32xf32, #tpu.memory_space<vmem>>, %arg4: memref<32x32xf32, #tpu.memory_space<vmem>>, %arg5: memref<1x32xf32, #tpu.memory_space<vmem>>, %arg6: memref<16x32xf32, #tpu.memory_space<vmem>>) attributes {dimension_semantics = [#tpu.dimension_semantics<parallel>, #tpu.dimension_semantics<parallel>, #tpu.dimension_semantics<arbitrary>], iteration_bounds = array<i64: 1, 1, 1>, scalar_prefetch = 0 : i64, scratch_operands = 0 : i64, tpu.core_type = #tpu.core_type<tc>, window_params = [{transform_indices = @transform_0, window_bounds = array<i64: 16, 32>}, {transform_indices = @transform_1, window_bounds = array<i64: 32, 32>}, {transform_indices = @transform_2, window_bounds = array<i64: 1, 32>}, {transform_indices = @transform_3, window_bounds = array<i64: 16, 32>}]} {
    %c0_i32 = arith.constant 0 : i32
    %0 = arith.cmpi eq, %arg2, %c0_i32 : i32
    %1 = arith.extui %0 : i1 to i32
    %c0_i32_0 = arith.constant 0 : i32
    %2 = arith.cmpi ne, %1, %c0_i32_0 : i32
    scf.if %2 {
      %cst_10 = arith.constant 0.000000e+00 : f32
      %12 = vector.broadcast %cst_10 : f32 to vector<16x32xf32>
      %c0_11 = arith.constant 0 : index
      %c0_12 = arith.constant 0 : index
      %13 = vector.load %arg6[%c0_11, %c0_12] : memref<16x32xf32, #tpu.memory_space<vmem>>, vector<16x32xf32>
      tpu.vector_store %arg6[%c0_11, %c0_12], %12 {strides = array<i32>} : memref<16x32xf32, #tpu.memory_space<vmem>>, vector<16x32xf32>,
    } else {
    }
    %c0 = arith.constant 0 : index
    %c0_1 = arith.constant 0 : index
    %3 = vector.load %arg6[%c0, %c0_1] : memref<16x32xf32, #tpu.memory_space<vmem>>, vector<16x32xf32>
    %c0_2 = arith.constant 0 : index
    %c0_3 = arith.constant 0 : index
    %4 = vector.load %arg3[%c0_2, %c0_3] : memref<16x32xf32, #tpu.memory_space<vmem>>, vector<16x32xf32>
    %c0_4 = arith.constant 0 : index
    %c0_5 = arith.constant 0 : index
    %5 = vector.load %arg4[%c0_4, %c0_5] : memref<32x32xf32, #tpu.memory_space<vmem>>, vector<32x32xf32>
    %cst = arith.constant dense<0.000000e+00> : vector<16x32xf32>
    %6 = tpu.matmul %4, %5, %cst {dimension_numbers = #tpu.dot_dimension_numbers<[1], [0], [0], [1], [0, 0, 1, 1], [], []>} : vector<16x32xf32>, vector<32x32xf32>, vector<16x32xf32> -> vector<16x32xf32>
    %7 = arith.addf %3, %6 : vector<16x32xf32>
    %c0_6 = arith.constant 0 : index
    %c0_7 = arith.constant 0 : index
    %8 = vector.load %arg6[%c0_6, %c0_7] : memref<16x32xf32, #tpu.memory_space<vmem>>, vector<16x32xf32>
    tpu.vector_store %arg6[%c0_6, %c0_7], %7 {strides = array<i32>} : memref<16x32xf32, #tpu.memory_space<vmem>>, vector<16x32xf32>,
    %c0_i32_8 = arith.constant 0 : i32
    %9 = arith.cmpi eq, %arg2, %c0_i32_8 : i32
    %10 = arith.extui %9 : i1 to i32
    %c0_i32_9 = arith.constant 0 : i32
    %11 = arith.cmpi ne, %10, %c0_i32_9 : i32
    scf.if %11 {
      %c0_10 = arith.constant 0 : index
      %c0_11 = arith.constant 0 : index
      %12 = vector.load %arg6[%c0_10, %c0_11] : memref<16x32xf32, #tpu.memory_space<vmem>>, vector<16x32xf32>
      %c0_12 = arith.constant 0 : index
      %c0_13 = arith.constant 0 : index
      %13 = vector.load %arg5[%c0_12, %c0_13] : memref<1x32xf32, #tpu.memory_space<vmem>>, vector<1x32xf32>
      %14 = vector.broadcast %13 : vector<1x32xf32> to vector<16x32xf32>
      %15 = arith.addf %12, %14 : vector<16x32xf32>
      %c0_14 = arith.constant 0 : index
      %c0_15 = arith.constant 0 : index
      %16 = vector.load %arg6[%c0_14, %c0_15] : memref<16x32xf32, #tpu.memory_space<vmem>>, vector<16x32xf32>
      tpu.vector_store %arg6[%c0_14, %c0_15], %15 {strides = array<i32>} : memref<16x32xf32, #tpu.memory_space<vmem>>, vector<16x32xf32>,
    } else {
    }
    return
  }
  func.func @transform_0(%arg0: i32, %arg1: i32, %arg2: i32) -> (i32, i32) {
    %c0_i32 = arith.constant 0 : i32
    return %arg0, %arg2 : i32, i32
  }
  func.func @transform_1(%arg0: i32, %arg1: i32, %arg2: i32) -> (i32, i32) {
    %c0_i32 = arith.constant 0 : i32
    return %arg2, %arg1 : i32, i32
  }
  func.func @transform_2(%arg0: i32, %arg1: i32, %arg2: i32) -> (i32, i32) {
    %c0_i32 = arith.constant 0 : i32
    %c0_i32_0 = arith.constant 0 : i32
    return %c0_i32, %arg1 : i32, i32
  }
  func.func @transform_3(%arg0: i32, %arg1: i32, %arg2: i32) -> (i32, i32) {
    %c0_i32 = arith.constant 0 : i32
    return %arg0, %arg1 : i32, i32
  }
}

module attributes {stable_mosaic.version = 11 : i64} {
  func.func @_linear_kernel_inplace(%arg0: i32, %arg1: i32, %arg2: i32, %arg3: memref<16x32xf32, #tpu.memory_space<vmem>>, %arg4: memref<32x32xf32, #tpu.memory_space<vmem>>, %arg5: memref<1x32xf32, #tpu.memory_space<vmem>>, %arg6: memref<16x32xf32, #tpu.memory_space<vmem>>) attributes {dimension_semantics = [#tpu.dimension_semantics<parallel>, #tpu.dimension_semantics<parallel>, #tpu.dimension_semantics<arbitrary>], iteration_bounds = array<i64: 1, 1, 1>, scalar_prefetch = 0 : i64, scratch_operands = 0 : i64, tpu.core_type = #tpu.core_type<tc>, window_params = [{transform_indices = @transform_0, window_bounds = array<i64: 16, 32>}, {transform_indices = @transform_1, window_bounds = array<i64: 32, 32>}, {transform_indices = @transform_2, window_bounds = array<i64: 1, 32>}, {transform_indices = @transform_3, window_bounds = array<i64: 16, 32>}]} {
    %c0_i32 = arith.constant 0 : i32
    %0 = arith.cmpi eq, %arg2, %c0_i32 : i32
    %1 = arith.extui %0 : i1 to i32
    %c0_i32_0 = arith.constant 0 : i32
    %2 = arith.cmpi ne, %1, %c0_i32_0 : i32
    scf.if %2 {
      %cst_10 = arith.constant 0.000000e+00 : f32
      %12 = vector.broadcast %cst_10 : f32 to vector<16x32xf32>
      %c0_11 = arith.constant 0 : index
      %c0_12 = arith.constant 0 : index
      %13 = vector.load %arg6[%c0_11, %c0_12] : memref<16x32xf32, #tpu.memory_space<vmem>>, vector<16x32xf32>
      tpu.vector_store %arg6[%c0_11, %c0_12], %12 {strides = array<i32>} : memref<16x32xf32, #tpu.memory_space<vmem>>, vector<16x32xf32>,
    } else {
    }
    %c0 = arith.constant 0 : index
    %c0_1 = arith.constant 0 : index
    %3 = vector.load %arg6[%c0, %c0_1] : memref<16x32xf32, #tpu.memory_space<vmem>>, vector<16x32xf32>
    %c0_2 = arith.constant 0 : index
    %c0_3 = arith.constant 0 : index
    %4 = vector.load %arg3[%c0_2, %c0_3] : memref<16x32xf32, #tpu.memory_space<vmem>>, vector<16x32xf32>
    %c0_4 = arith.constant 0 : index
    %c0_5 = arith.constant 0 : index
    %5 = vector.load %arg4[%c0_4, %c0_5] : memref<32x32xf32, #tpu.memory_space<vmem>>, vector<32x32xf32>
    %cst = arith.constant dense<0.000000e+00> : vector<16x32xf32>
    %6 = tpu.matmul %4, %5, %cst {dimension_numbers = #tpu.dot_dimension_numbers<[1], [0], [0], [1], [0, 0, 1, 1], [], []>} : vector<16x32xf32>, vector<32x32xf32>, vector<16x32xf32> -> vector<16x32xf32>
    %7 = arith.addf %3, %6 : vector<16x32xf32>
    %c0_6 = arith.constant 0 : index
    %c0_7 = arith.constant 0 : index
    %8 = vector.load %arg6[%c0_6, %c0_7] : memref<16x32xf32, #tpu.memory_space<vmem>>, vector<16x32xf32>
    tpu.vector_store %arg6[%c0_6, %c0_7], %7 {strides = array<i32>} : memref<16x32xf32, #tpu.memory_space<vmem>>, vector<16x32xf32>,
    %c0_i32_8 = arith.constant 0 : i32
    %9 = arith.cmpi eq, %arg2, %c0_i32_8 : i32
    %10 = arith.extui %9 : i1 to i32
    %c0_i32_9 = arith.constant 0 : i32
    %11 = arith.cmpi ne, %10, %c0_i32_9 : i32
    scf.if %11 {
      %c0_10 = arith.constant 0 : index
      %c0_11 = arith.constant 0 : index
      %12 = vector.load %arg6[%c0_10, %c0_11] : memref<16x32xf32, #tpu.memory_space<vmem>>, vector<16x32xf32>
      %c0_12 = arith.constant 0 : index
      %c0_13 = arith.constant 0 : index
      %13 = vector.load %arg5[%c0_12, %c0_13] : memref<1x32xf32, #tpu.memory_space<vmem>>, vector<1x32xf32>
      %14 = vector.broadcast %13 : vector<1x32xf32> to vector<16x32xf32>
      %15 = arith.addf %12, %14 : vector<16x32xf32>
      %c0_14 = arith.constant 0 : index
      %c0_15 = arith.constant 0 : index
      %16 = vector.load %arg6[%c0_14, %c0_15] : memref<16x32xf32, #tpu.memory_space<vmem>>, vector<16x32xf32>
      tpu.vector_store %arg6[%c0_14, %c0_15], %15 {strides = array<i32>} : memref<16x32xf32, #tpu.memory_space<vmem>>, vector<16x32xf32>,
    } else {
    }
    return
  }
  func.func @transform_0(%arg0: i32, %arg1: i32, %arg2: i32) -> (i32, i32) {
    %c0_i32 = arith.constant 0 : i32
    return %arg0, %arg2 : i32, i32
  }
  func.func @transform_1(%arg0: i32, %arg1: i32, %arg2: i32) -> (i32, i32) {
    %c0_i32 = arith.constant 0 : i32
    return %arg2, %arg1 : i32, i32
  }
  func.func @transform_2(%arg0: i32, %arg1: i32, %arg2: i32) -> (i32, i32) {
    %c0_i32 = arith.constant 0 : i32
    %c0_i32_0 = arith.constant 0 : i32
    return %c0_i32, %arg1 : i32, i32
  }
  func.func @transform_3(%arg0: i32, %arg1: i32, %arg2: i32) -> (i32, i32) {
    %c0_i32 = arith.constant 0 : i32
    return %arg0, %arg1 : i32, i32
  }
}

module attributes {stable_mosaic.version = 11 : i64} {
  func.func @_flash_attn_kernel(%arg0: i32, %arg1: i32, %arg2: i32, %arg3: i32, %arg4: memref<1x1x8x8xf32, #tpu.memory_space<vmem>>, %arg5: memref<1x1x8x8xf32, #tpu.memory_space<vmem>>, %arg6: memref<1x1x8x8xf32, #tpu.memory_space<vmem>>, %arg7: memref<1x1x8x8xf32, #tpu.memory_space<vmem>>, %arg8: memref<1x1x8x8xf32, #tpu.memory_space<vmem>>, %arg9: memref<8x1xf32, #tpu.memory_space<vmem>>, %arg10: memref<8x1xf32, #tpu.memory_space<vmem>>, %arg11: memref<8x8xf32, #tpu.memory_space<vmem>>) attributes {dimension_semantics = [#tpu.dimension_semantics<parallel>, #tpu.dimension_semantics<parallel>, #tpu.dimension_semantics<parallel>, #tpu.dimension_semantics<arbitrary>], iteration_bounds = array<i64: 2, 4, 1, 1>, scalar_prefetch = 0 : i64, scratch_operands = 3 : i64, tpu.core_type = #tpu.core_type<tc>, window_params = [{transform_indices = @transform_0, window_bounds = array<i64: 1, 1, 8, 8>}, {transform_indices = @transform_1, window_bounds = array<i64: 1, 1, 8, 8>}, {transform_indices = @transform_2, window_bounds = array<i64: 1, 1, 8, 8>}, {transform_indices = @transform_3, window_bounds = array<i64: 1, 1, 8, 8>}, {transform_indices = @transform_4, window_bounds = array<i64: 1, 1, 8, 8>}]} {
    %c0_i32 = arith.constant 0 : i32
    %0 = arith.cmpi eq, %arg3, %c0_i32 : i32
    %1 = arith.extui %0 : i1 to i32
    %c0_i32_0 = arith.constant 0 : i32
    %2 = arith.cmpi ne, %1, %c0_i32_0 : i32
    scf.if %2 {
      %cst_34 = arith.constant 0xFF800000 : f32
      %40 = vector.broadcast %cst_34 : f32 to vector<8x1xf32>
      %c0_35 = arith.constant 0 : index
      %c0_36 = arith.constant 0 : index
      %41 = vector.load %arg9[%c0_35, %c0_36] : memref<8x1xf32, #tpu.memory_space<vmem>>, vector<8x1xf32>
      tpu.vector_store %arg9[%c0_35, %c0_36], %40 {strides = array<i32>} : memref<8x1xf32, #tpu.memory_space<vmem>>, vector<8x1xf32>,
      %cst_37 = arith.constant 0.000000e+00 : f32
      %42 = vector.broadcast %cst_37 : f32 to vector<8x1xf32>
      %c0_38 = arith.constant 0 : index
      %c0_39 = arith.constant 0 : index
      %43 = vector.load %arg10[%c0_38, %c0_39] : memref<8x1xf32, #tpu.memory_space<vmem>>, vector<8x1xf32>
      tpu.vector_store %arg10[%c0_38, %c0_39], %42 {strides = array<i32>} : memref<8x1xf32, #tpu.memory_space<vmem>>, vector<8x1xf32>,
      %cst_40 = arith.constant 0.000000e+00 : f32
      %44 = vector.broadcast %cst_40 : f32 to vector<8x8xf32>
      %c0_41 = arith.constant 0 : index
      %c0_42 = arith.constant 0 : index
      %45 = vector.load %arg11[%c0_41, %c0_42] : memref<8x8xf32, #tpu.memory_space<vmem>>, vector<8x8xf32>
      tpu.vector_store %arg11[%c0_41, %c0_42], %44 {strides = array<i32>} : memref<8x8xf32, #tpu.memory_space<vmem>>, vector<8x8xf32>,
    } else {
    }
    %c0 = arith.constant 0 : index
    %c0_1 = arith.constant 0 : index
    %c0_2 = arith.constant 0 : index
    %c0_3 = arith.constant 0 : index
    %3 = vector.load %arg4[%c0, %c0_1, %c0_2, %c0_3] : memref<1x1x8x8xf32, #tpu.memory_space<vmem>>, vector<1x1x8x8xf32>
    %4 = vector.shape_cast %3 : vector<1x1x8x8xf32> to vector<8x8xf32>
    %c0_4 = arith.constant 0 : index
    %c0_5 = arith.constant 0 : index
    %c0_6 = arith.constant 0 : index
    %c0_7 = arith.constant 0 : index
    %5 = vector.load %arg5[%c0_4, %c0_5, %c0_6, %c0_7] : memref<1x1x8x8xf32, #tpu.memory_space<vmem>>, vector<1x1x8x8xf32>
    %6 = vector.shape_cast %5 : vector<1x1x8x8xf32> to vector<8x8xf32>
    %c0_8 = arith.constant 0 : index
    %c0_9 = arith.constant 0 : index
    %c0_10 = arith.constant 0 : index
    %c0_11 = arith.constant 0 : index
    %7 = vector.load %arg6[%c0_8, %c0_9, %c0_10, %c0_11] : memref<1x1x8x8xf32, #tpu.memory_space<vmem>>, vector<1x1x8x8xf32>
    %8 = vector.shape_cast %7 : vector<1x1x8x8xf32> to vector<8x8xf32>
    %c0_12 = arith.constant 0 : index
    %c0_13 = arith.constant 0 : index
    %c0_14 = arith.constant 0 : index
    %c0_15 = arith.constant 0 : index
    %9 = vector.load %arg7[%c0_12, %c0_13, %c0_14, %c0_15] : memref<1x1x8x8xf32, #tpu.memory_space<vmem>>, vector<1x1x8x8xf32>
    %10 = vector.shape_cast %9 : vector<1x1x8x8xf32> to vector<8x8xf32>
    %cst = arith.constant 0.176776692 : f32
    %11 = vector.broadcast %cst : f32 to vector<8x8xf32>
    %12 = arith.mulf %4, %11 : vector<8x8xf32>
    %cst_16 = arith.constant dense<0.000000e+00> : vector<8x8xf32>
    %13 = tpu.matmul %12, %6, %cst_16 {dimension_numbers = #tpu.dot_dimension_numbers<[1], [1], [0], [0], [0, 0, 1, 0], [], []>} : vector<8x8xf32>, vector<8x8xf32>, vector<8x8xf32> -> vector<8x8xf32>
    %14 = arith.addf %13, %10 : vector<8x8xf32>
    %c0_17 = arith.constant 0 : index
    %c0_18 = arith.constant 0 : index
    %15 = vector.load %arg9[%c0_17, %c0_18] : memref<8x1xf32, #tpu.memory_space<vmem>>, vector<8x1xf32>
    %cst_19 = arith.constant dense<0xFF800000> : vector<8xf32>
    %16 = vector.multi_reduction <maximumf>, %14, %cst_19 [1] : vector<8x8xf32> to vector<8xf32>
    %17 = vector.shape_cast %16 : vector<8xf32> to vector<8x1xf32>
    %18 = arith.maximumf %15, %17 : vector<8x1xf32>
    %19 = arith.subf %15, %18 : vector<8x1xf32>
    %20 = math.exp %19 : vector<8x1xf32>
    %21 = vector.broadcast %18 : vector<8x1xf32> to vector<8x8xf32>
    %22 = arith.subf %14, %21 : vector<8x8xf32>
    %23 = math.exp %22 : vector<8x8xf32>
    %c0_20 = arith.constant 0 : index
    %c0_21 = arith.constant 0 : index
    %24 = vector.load %arg10[%c0_20, %c0_21] : memref<8x1xf32, #tpu.memory_space<vmem>>, vector<8x1xf32>
    %25 = arith.mulf %20, %24 : vector<8x1xf32>
    %cst_22 = arith.constant dense<0.000000e+00> : vector<8xf32>
    %26 = vector.multi_reduction <add>, %23, %cst_22 [1] : vector<8x8xf32> to vector<8xf32>
    %27 = vector.shape_cast %26 : vector<8xf32> to vector<8x1xf32>
    %28 = arith.addf %25, %27 : vector<8x1xf32>
    %c0_23 = arith.constant 0 : index
    %c0_24 = arith.constant 0 : index
    %29 = vector.load %arg10[%c0_23, %c0_24] : memref<8x1xf32, #tpu.memory_space<vmem>>, vector<8x1xf32>
    tpu.vector_store %arg10[%c0_23, %c0_24], %28 {strides = array<i32>} : memref<8x1xf32, #tpu.memory_space<vmem>>, vector<8x1xf32>,
    %c0_25 = arith.constant 0 : index
    %c0_26 = arith.constant 0 : index
    %30 = vector.load %arg11[%c0_25, %c0_26] : memref<8x8xf32, #tpu.memory_space<vmem>>, vector<8x8xf32>
    %31 = vector.broadcast %20 : vector<8x1xf32> to vector<8x8xf32>
    %32 = arith.mulf %31, %30 : vector<8x8xf32>
    %cst_27 = arith.constant dense<0.000000e+00> : vector<8x8xf32>
    %33 = tpu.matmul %23, %8, %cst_27 {dimension_numbers = #tpu.dot_dimension_numbers<[1], [0], [0], [1], [0, 0, 1, 1], [], []>} : vector<8x8xf32>, vector<8x8xf32>, vector<8x8xf32> -> vector<8x8xf32>
    %34 = arith.addf %32, %33 : vector<8x8xf32>
    %c0_28 = arith.constant 0 : index
    %c0_29 = arith.constant 0 : index
    %35 = vector.load %arg11[%c0_28, %c0_29] : memref<8x8xf32, #tpu.memory_space<vmem>>, vector<8x8xf32>
    tpu.vector_store %arg11[%c0_28, %c0_29], %34 {strides = array<i32>} : memref<8x8xf32, #tpu.memory_space<vmem>>, vector<8x8xf32>,
    %c0_30 = arith.constant 0 : index
    %c0_31 = arith.constant 0 : index
    %36 = vector.load %arg9[%c0_30, %c0_31] : memref<8x1xf32, #tpu.memory_space<vmem>>, vector<8x1xf32>
    tpu.vector_store %arg9[%c0_30, %c0_31], %18 {strides = array<i32>} : memref<8x1xf32, #tpu.memory_space<vmem>>, vector<8x1xf32>,
    %c0_i32_32 = arith.constant 0 : i32
    %37 = arith.cmpi eq, %arg3, %c0_i32_32 : i32
    %38 = arith.extui %37 : i1 to i32
    %c0_i32_33 = arith.constant 0 : i32
    %39 = arith.cmpi ne, %38, %c0_i32_33 : i32
    scf.if %39 {
      %c0_34 = arith.constant 0 : index
      %c0_35 = arith.constant 0 : index
      %40 = vector.load %arg10[%c0_34, %c0_35] : memref<8x1xf32, #tpu.memory_space<vmem>>, vector<8x1xf32>
      %41 = tpu.reciprocal %40 : vector<8x1xf32> -> vector<8x1xf32>
      %c0_36 = arith.constant 0 : index
      %c0_37 = arith.constant 0 : index
      %42 = vector.load %arg11[%c0_36, %c0_37] : memref<8x8xf32, #tpu.memory_space<vmem>>, vector<8x8xf32>
      %43 = vector.broadcast %41 : vector<8x1xf32> to vector<8x8xf32>
      %44 = arith.mulf %42, %43 : vector<8x8xf32>
      %c0_38 = arith.constant 0 : index
      %c0_39 = arith.constant 0 : index
      %c0_40 = arith.constant 0 : index
      %c0_41 = arith.constant 0 : index
      %45 = vector.load %arg8[%c0_38, %c0_39, %c0_40, %c0_41] : memref<1x1x8x8xf32, #tpu.memory_space<vmem>>, vector<1x1x8x8xf32>
      %46 = vector.shape_cast %45 : vector<1x1x8x8xf32> to vector<8x8xf32>
      %47 = vector.shape_cast %44 : vector<8x8xf32> to vector<1x1x8x8xf32>
      tpu.vector_store %arg8[%c0_38, %c0_39, %c0_40, %c0_41], %47 {strides = array<i32>} : memref<1x1x8x8xf32, #tpu.memory_space<vmem>>, vector<1x1x8x8xf32>,
    } else {
    }
    return
  }
  func.func @transform_0(%arg0: i32, %arg1: i32, %arg2: i32, %arg3: i32) -> (i32, i32, i32, i32) {
    %c0_i32 = arith.constant 0 : i32
    %c0_i32_0 = arith.constant 0 : i32
    return %arg0, %arg1, %arg2, %c0_i32 : i32, i32, i32, i32
  }
  func.func @transform_1(%arg0: i32, %arg1: i32, %arg2: i32, %arg3: i32) -> (i32, i32, i32, i32) {
    %c0_i32 = arith.constant 0 : i32
    %c0_i32_0 = arith.constant 0 : i32
    return %arg0, %arg1, %arg3, %c0_i32 : i32, i32, i32, i32
  }
  func.func @transform_2(%arg0: i32, %arg1: i32, %arg2: i32, %arg3: i32) -> (i32, i32, i32, i32) {
    %c0_i32 = arith.constant 0 : i32
    %c0_i32_0 = arith.constant 0 : i32
    return %arg0, %arg1, %arg3, %c0_i32 : i32, i32, i32, i32
  }
  func.func @transform_3(%arg0: i32, %arg1: i32, %arg2: i32, %arg3: i32) -> (i32, i32, i32, i32) {
    %c0_i32 = arith.constant 0 : i32
    %c0_i32_0 = arith.constant 0 : i32
    %c0_i32_1 = arith.constant 0 : i32
    return %c0_i32, %c0_i32_0, %arg2, %arg3 : i32, i32, i32, i32
  }
  func.func @transform_4(%arg0: i32, %arg1: i32, %arg2: i32, %arg3: i32) -> (i32, i32, i32, i32) {
    %c0_i32 = arith.constant 0 : i32
    %c0_i32_0 = arith.constant 0 : i32
    return %arg0, %arg1, %arg2, %c0_i32 : i32, i32, i32, i32
  }
}

module attributes {stable_mosaic.version = 11 : i64} {
  func.func @_linear_kernel_inplace(%arg0: i32, %arg1: i32, %arg2: i32, %arg3: memref<16x32xf32, #tpu.memory_space<vmem>>, %arg4: memref<32x32xf32, #tpu.memory_space<vmem>>, %arg5: memref<1x32xf32, #tpu.memory_space<vmem>>, %arg6: memref<16x32xf32, #tpu.memory_space<vmem>>) attributes {dimension_semantics = [#tpu.dimension_semantics<parallel>, #tpu.dimension_semantics<parallel>, #tpu.dimension_semantics<arbitrary>], iteration_bounds = array<i64: 1, 1, 1>, scalar_prefetch = 0 : i64, scratch_operands = 0 : i64, tpu.core_type = #tpu.core_type<tc>, window_params = [{transform_indices = @transform_0, window_bounds = array<i64: 16, 32>}, {transform_indices = @transform_1, window_bounds = array<i64: 32, 32>}, {transform_indices = @transform_2, window_bounds = array<i64: 1, 32>}, {transform_indices = @transform_3, window_bounds = array<i64: 16, 32>}]} {
    %c0_i32 = arith.constant 0 : i32
    %0 = arith.cmpi eq, %arg2, %c0_i32 : i32
    %1 = arith.extui %0 : i1 to i32
    %c0_i32_0 = arith.constant 0 : i32
    %2 = arith.cmpi ne, %1, %c0_i32_0 : i32
    scf.if %2 {
      %cst_10 = arith.constant 0.000000e+00 : f32
      %12 = vector.broadcast %cst_10 : f32 to vector<16x32xf32>
      %c0_11 = arith.constant 0 : index
      %c0_12 = arith.constant 0 : index
      %13 = vector.load %arg6[%c0_11, %c0_12] : memref<16x32xf32, #tpu.memory_space<vmem>>, vector<16x32xf32>
      tpu.vector_store %arg6[%c0_11, %c0_12], %12 {strides = array<i32>} : memref<16x32xf32, #tpu.memory_space<vmem>>, vector<16x32xf32>,
    } else {
    }
    %c0 = arith.constant 0 : index
    %c0_1 = arith.constant 0 : index
    %3 = vector.load %arg6[%c0, %c0_1] : memref<16x32xf32, #tpu.memory_space<vmem>>, vector<16x32xf32>
    %c0_2 = arith.constant 0 : index
    %c0_3 = arith.constant 0 : index
    %4 = vector.load %arg3[%c0_2, %c0_3] : memref<16x32xf32, #tpu.memory_space<vmem>>, vector<16x32xf32>
    %c0_4 = arith.constant 0 : index
    %c0_5 = arith.constant 0 : index
    %5 = vector.load %arg4[%c0_4, %c0_5] : memref<32x32xf32, #tpu.memory_space<vmem>>, vector<32x32xf32>
    %cst = arith.constant dense<0.000000e+00> : vector<16x32xf32>
    %6 = tpu.matmul %4, %5, %cst {dimension_numbers = #tpu.dot_dimension_numbers<[1], [0], [0], [1], [0, 0, 1, 1], [], []>} : vector<16x32xf32>, vector<32x32xf32>, vector<16x32xf32> -> vector<16x32xf32>
    %7 = arith.addf %3, %6 : vector<16x32xf32>
    %c0_6 = arith.constant 0 : index
    %c0_7 = arith.constant 0 : index
    %8 = vector.load %arg6[%c0_6, %c0_7] : memref<16x32xf32, #tpu.memory_space<vmem>>, vector<16x32xf32>
    tpu.vector_store %arg6[%c0_6, %c0_7], %7 {strides = array<i32>} : memref<16x32xf32, #tpu.memory_space<vmem>>, vector<16x32xf32>,
    %c0_i32_8 = arith.constant 0 : i32
    %9 = arith.cmpi eq, %arg2, %c0_i32_8 : i32
    %10 = arith.extui %9 : i1 to i32
    %c0_i32_9 = arith.constant 0 : i32
    %11 = arith.cmpi ne, %10, %c0_i32_9 : i32
    scf.if %11 {
      %c0_10 = arith.constant 0 : index
      %c0_11 = arith.constant 0 : index
      %12 = vector.load %arg6[%c0_10, %c0_11] : memref<16x32xf32, #tpu.memory_space<vmem>>, vector<16x32xf32>
      %c0_12 = arith.constant 0 : index
      %c0_13 = arith.constant 0 : index
      %13 = vector.load %arg5[%c0_12, %c0_13] : memref<1x32xf32, #tpu.memory_space<vmem>>, vector<1x32xf32>
      %14 = vector.broadcast %13 : vector<1x32xf32> to vector<16x32xf32>
      %15 = arith.addf %12, %14 : vector<16x32xf32>
      %c0_14 = arith.constant 0 : index
      %c0_15 = arith.constant 0 : index
      %16 = vector.load %arg6[%c0_14, %c0_15] : memref<16x32xf32, #tpu.memory_space<vmem>>, vector<16x32xf32>
      tpu.vector_store %arg6[%c0_14, %c0_15], %15 {strides = array<i32>} : memref<16x32xf32, #tpu.memory_space<vmem>>, vector<16x32xf32>,
    } else {
    }
    return
  }
  func.func @transform_0(%arg0: i32, %arg1: i32, %arg2: i32) -> (i32, i32) {
    %c0_i32 = arith.constant 0 : i32
    return %arg0, %arg2 : i32, i32
  }
  func.func @transform_1(%arg0: i32, %arg1: i32, %arg2: i32) -> (i32, i32) {
    %c0_i32 = arith.constant 0 : i32
    return %arg2, %arg1 : i32, i32
  }
  func.func @transform_2(%arg0: i32, %arg1: i32, %arg2: i32) -> (i32, i32) {
    %c0_i32 = arith.constant 0 : i32
    %c0_i32_0 = arith.constant 0 : i32
    return %c0_i32, %arg1 : i32, i32
  }
  func.func @transform_3(%arg0: i32, %arg1: i32, %arg2: i32) -> (i32, i32) {
    %c0_i32 = arith.constant 0 : i32
    return %arg0, %arg1 : i32, i32
  }
}

</mosaic_0001>

<bundles_post_ra>
// kernel: self_attention_forward.6
= control target key start
LH: loop header
LB: loop body
LE: loop exit
PB: predicated region body
PF: predicated region fallthrough
CT: control target
= control target key end

     0   :  { %8 = vsyncpa [#allocation3], 0  ;;  %s134_s15 = smov [#allocation2]   ;;  %s135_s17 = smov 128   ;;  %s208_s0 = inlined_call_operand.vmem [shape: f32[16,32], index: 0, kind: input, shape index: {}]   ;;  %s209_s1 = inlined_call_operand.hbm [shape: f32[32,32], index: 1, kind: input, shape index: {}]   ;;  %s210_s2 = inlined_call_operand.vmem [shape: f32[1,32], index: 2, kind: input, shape index: {}]   ;;  %s211_s3 = inlined_call_operand.vmem [shape: f32[16,32], index: 3, kind: output, shape index: {}]  }
   0x1   :  { %s15_s14 = sshll.u32 %s209_s1, 4  ;;  %s17_s16 = sshll.u32 %s134_s15, 4  ;;  %s16_s14 = int_to_ptr.hbm [resolvable:$true] %s15_s14  ;;  %s18_s16 = int_to_ptr.vmem [resolvable:$true] %s17_s16 }
   0x2   :  { %s136_s18 = smov 8  }
   0x3   :  { %23 = dma.hbm_to_vmem [thread:$0]  %s16_s14, 512, %s18_s16, [#allocation3], %s135_s17, %s135_s17, %s136_s18  }
   0x4   :  { %132 = dma.done.wait [#allocation3], 512  }
   0x5   :  { %133 = vsyncadd [#allocation3], 4294966784  ;;  %vm34_vm0 = vcmask 261120   ;;  %v137_v0 = vmov 0.0   ;;  %v44_v1 = vld [vmem:[#allocation2 + $0x18] sm:$0xff]  ;;  %v43_v2 = vld [vmem:[#allocation2 + $0x10] sm:$0xff] }
   0x6   :  { %35 = vst.msk [vmem:[%s211_s3] sm:$0xff] %vm34_vm0, %v137_v0  ;;  %64 = vmatpush.msra.mxu0 %v44_v1  ;;  %99 = vmatpush.msra.mxu1 %v44_v1  ;;  %v42_v3 = vld [vmem:[#allocation2 + $0x8] sm:$0xff]  ;;  %v41_v4 = vld [vmem:[#allocation2] sm:$0xff] }
   0x7   :  { %36 = vst.msk [vmem:[%s211_s3 + $0x8] sm:$0xff] %vm34_vm0, %v137_v0  ;;  %v39_v5 = vld [vmem:[%s208_s0] sm:$0xff]  ;;  %v40_v6 = vld [vmem:[%s208_s0 + $0x8] sm:$0xff] }
   0x8   :  { %65 = vmatpush.msra.mxu0 %v43_v2  ;;  %100 = vmatpush.msra.mxu1 %v43_v2  ;;  %v107_v13 = vld [vmem:[%s210_s2] ss:$0 sm:$0xff] }
   0xa   :  { %66 = vmatpush.msra.mxu0 %v42_v3  ;;  %101 = vmatpush.msra.mxu1 %v42_v3 }
   0xc   :  { %67 = vmatpush.msra.mxu0 %v41_v4  ;;  %102 = vmatpush.msra.mxu1 %v41_v4 }
   0xd   :  { %97 = vmatmul.msk.f32.vlgmr.msra.gmra.mxu0 %vm34_vm0, %v39_v5  ;;  %98 = vmatmul.msk.f32.vlgmr.msra.gmra.mxu1 %vm34_vm0, %v40_v6  ;;  %v37_v7 = vld [vmem:[%s211_s3] sm:$0xff] }
   0xe   :  { %v38_v8 = vld [vmem:[%s211_s3 + $0x8] sm:$0xff] }
  0x8a   :  { %v69_v9 = vpop.f32.mrf.mxu0  ;;  %v72_v10 = vpop.f32.mrf.mxu1 }
  0x8b   :  { %v75_v11 = vadd.f32 %v69_v9, %v37_v7  ;;  %v76_v12 = vadd.f32 %v72_v10, %v38_v8 }
  0x8d   :  { %77 = vst.msk [vmem:[%s211_s3] sm:$0xff] %vm34_vm0, %v75_v11 }
  0x8e   :  { %78 = vst.msk [vmem:[%s211_s3 + $0x8] sm:$0xff] %vm34_vm0, %v76_v12 }
  0x94   :  { %v82_v14 = vld [vmem:[%s211_s3] sm:$0xff] }
  0x95   :  { %v88_v15 = vadd.f32 %v107_v13, %v82_v14  ;;  %v83_v16 = vld [vmem:[%s211_s3 + $0x8] sm:$0xff] }
  0x96   :  { %v89_v17 = vadd.f32 %v107_v13, %v83_v16 }
  0x97   :  { %90 = vst.msk [vmem:[%s211_s3] sm:$0xff] %vm34_vm0, %v88_v15 }
  0x98   :  { %91 = vst.msk [vmem:[%s211_s3 + $0x8] sm:$0xff] %vm34_vm0, %v89_v17 }
  0x99   :  { %96 = vsyncpa [#allocation3], 1 }

// kernel: self_attention_forward.7
= control target key start
LH: loop header
LB: loop body
LE: loop exit
PB: predicated region body
PF: predicated region fallthrough
CT: control target
= control target key end

     0   :  { %8 = vsyncpa [#allocation3], 0  ;;  %s250_s0 = inlined_call_operand.hbm [shape: f32[16,32], index: 0, kind: input, shape index: {}]   ;;  %s251_s1 = inlined_call_operand.hbm [shape: f32[32,32], index: 1, kind: input, shape index: {}]   ;;  %s252_s2 = inlined_call_operand.vmem [shape: f32[1,32], index: 2, kind: input, shape index: {}]   ;;  %s253_s3 = inlined_call_operand.vmem [shape: f32[16,32], index: 3, kind: output, shape index: {}]  }
   0x1   :  { %s14_s14 = sshll.u32 %s250_s0, 4  ;;  %s15_s14 = int_to_ptr.hbm [resolvable:$true] %s14_s14 }
   0x2   :  { %9 = vsyncpa [#allocation5], 0  ;;  %s178_s15 = smov [#allocation2]   ;;  %s27_s19 = sshll.u32 %s251_s1, 4  ;;  %s28_s19 = int_to_ptr.hbm [resolvable:$true] %s27_s19 }
   0x3   :  { %s16_s16 = sshll.u32 %s178_s15, 4  ;;  %s179_s20 = smov 128   ;;  %s17_s16 = int_to_ptr.vmem [resolvable:$true] %s16_s16 }
   0x4   :  { %s180_s21 = smov 8   ;;  %s181_s22 = smov [#allocation4]  }
   0x5   :  { %22 = dma.hbm_to_vmem [thread:$0]  %s15_s14, 256, %s17_s16, [#allocation3], %s179_s20, %s179_s20, %s180_s21  }
   0x6   :  { %s29_s23 = sshll.u32 %s181_s22, 4  ;;  %s30_s23 = int_to_ptr.vmem [resolvable:$true] %s29_s23 }
   0x7   :  { %35 = dma.hbm_to_vmem [thread:$0]  %s28_s19, 512, %s30_s23, [#allocation5], %s179_s20, %s179_s20, %s180_s21  }
   0x8   :  { %174 = dma.done.wait [#allocation3], 256  }
   0x9   :  { %175 = vsyncadd [#allocation3], 4294967040 }
   0xa   :  { %176 = dma.done.wait [#allocation5], 512  }
   0xb   :  { %177 = vsyncadd [#allocation5], 4294966784  ;;  %vm50_vm0 = vcmask 261120   ;;  %v182_v0 = vmov 0.0   ;;  %v60_v1 = vld [vmem:[#allocation4 + $0x18] sm:$0xff]  ;;  %v59_v2 = vld [vmem:[#allocation4 + $0x10] sm:$0xff] }
   0xc   :  { %51 = vst.msk [vmem:[%s253_s3] sm:$0xff] %vm50_vm0, %v182_v0  ;;  %80 = vmatpush.msra.mxu0 %v60_v1  ;;  %116 = vmatpush.msra.mxu1 %v60_v1  ;;  %v58_v3 = vld [vmem:[#allocation4 + $0x8] sm:$0xff]  ;;  %v57_v4 = vld [vmem:[#allocation4] sm:$0xff]  ;;  %v55_v5 = vld [vmem:[#allocation2] sm:$0xff] }
   0xd   :  { %52 = vst.msk [vmem:[%s253_s3 + $0x8] sm:$0xff] %vm50_vm0, %v182_v0  ;;  %v56_v6 = vld [vmem:[#allocation2 + $0x8] sm:$0xff]  ;;  %v125_v13 = vld [vmem:[%s252_s2] ss:$0 sm:$0xff] }
   0xe   :  { %81 = vmatpush.msra.mxu0 %v59_v2  ;;  %117 = vmatpush.msra.mxu1 %v59_v2 }
  0x10   :  { %82 = vmatpush.msra.mxu0 %v58_v3  ;;  %118 = vmatpush.msra.mxu1 %v58_v3 }
  0x12   :  { %83 = vmatpush.msra.mxu0 %v57_v4  ;;  %119 = vmatpush.msra.mxu1 %v57_v4 }
  0x13   :  { %114 = vmatmul.msk.f32.vlgmr.msra.gmra.mxu0 %vm50_vm0, %v55_v5  ;;  %115 = vmatmul.msk.f32.vlgmr.msra.gmra.mxu1 %vm50_vm0, %v56_v6  ;;  %v53_v7 = vld [vmem:[%s253_s3] sm:$0xff] }
  0x14   :  { %v54_v8 = vld [vmem:[%s253_s3 + $0x8] sm:$0xff] }
  0x90   :  { %v85_v9 = vpop.f32.mrf.mxu0  ;;  %v88_v10 = vpop.f32.mrf.mxu1 }
  0x91   :  { %v91_v11 = vadd.f32 %v85_v9, %v53_v7  ;;  %v92_v12 = vadd.f32 %v88_v10, %v54_v8 }
  0x93   :  { %93 = vst.msk [vmem:[%s253_s3] sm:$0xff] %vm50_vm0, %v91_v11 }
  0x94   :  { %94 = vst.msk [vmem:[%s253_s3 + $0x8] sm:$0xff] %vm50_vm0, %v92_v12 }
  0x9a   :  { %v98_v14 = vld [vmem:[%s253_s3] sm:$0xff] }
  0x9b   :  { %v104_v15 = vadd.f32 %v125_v13, %v98_v14  ;;  %v99_v16 = vld [vmem:[%s253_s3 + $0x8] sm:$0xff] }
  0x9c   :  { %v105_v17 = vadd.f32 %v125_v13, %v99_v16 }
  0x9d   :  { %106 = vst.msk [vmem:[%s253_s3] sm:$0xff] %vm50_vm0, %v104_v15 }
  0x9e   :  { %107 = vst.msk [vmem:[%s253_s3 + $0x8] sm:$0xff] %vm50_vm0, %v105_v17 }
  0x9f   :  { %112 = vsyncpa [#allocation3], 1 }
  0xa0   :  { %113 = vsyncpa [#allocation5], 1 }

// kernel: self_attention_forward.9
= control target key start
LH: loop header
LB: loop body
LE: loop exit
PB: predicated region body
PF: predicated region fallthrough
CT: control target
= control target key end

     0   :  { %vm19_vm0 = vcmask 261120   ;;  %v132_v2 = vmov 0.0   ;;  %s188_s0 = inlined_call_operand.vmem [shape: f32[16,32], index: 0, kind: input, shape index: {}]   ;;  %s189_s1 = inlined_call_operand.vmem [shape: f32[32,32], index: 1, kind: input, shape index: {}]   ;;  %s190_s2 = inlined_call_operand.vmem [shape: f32[1,32], index: 2, kind: input, shape index: {}]   ;;  %s191_s3 = inlined_call_operand.hbm [shape: f32[16,32], index: 3, kind: output, shape index: {}]  }
   0x1   :  { %v29_v0 = vld [vmem:[%s189_s1 + $0x18] sm:$0xff]  ;;  %v28_v1 = vld [vmem:[%s189_s1 + $0x10] sm:$0xff]  ;;  %20 = vst.msk [vmem:[#allocation2] sm:$0xff] %vm19_vm0, %v132_v2  ;;  %v27_v3 = vld [vmem:[%s189_s1 + $0x8] sm:$0xff] }
   0x2   :  { %49 = vmatpush.msra.mxu0 %v29_v0  ;;  %97 = vmatpush.msra.mxu1 %v29_v0  ;;  %21 = vst.msk [vmem:[#allocation2 + $0x8] sm:$0xff] %vm19_vm0, %v132_v2 }
   0x3   :  { %8 = vsyncpa [#allocation3], 0  ;;  %v26_v4 = vld [vmem:[%s189_s1] sm:$0xff]  ;;  %v25_v6 = vld [vmem:[%s188_s0 + $0x8] sm:$0xff]  ;;  %s83_s28 = sshll.u32 %s191_s3, 4  ;;  %s134_s29 = smov 128   ;;  %s84_s28 = int_to_ptr.hbm [resolvable:$true] %s83_s28 }
   0x4   :  { %50 = vmatpush.msra.mxu0 %v28_v1  ;;  %98 = vmatpush.msra.mxu1 %v28_v1  ;;  %v24_v5 = vld [vmem:[%s188_s0] sm:$0xff]  ;;  %s133_s0 = smov [#allocation2]   ;;  %s135_s30 = smov 8  }
   0x5   :  { %v105_v13 = vld [vmem:[%s190_s2] ss:$0 sm:$0xff]  ;;  %s81_s25 = sshll.u32 %s133_s0, 4  ;;  %s82_s25 = int_to_ptr.vmem [resolvable:$true] %s81_s25 }
   0x6   :  { %51 = vmatpush.msra.mxu0 %v27_v3  ;;  %99 = vmatpush.msra.mxu1 %v27_v3 }
   0x8   :  { %52 = vmatpush.msra.mxu0 %v26_v4  ;;  %100 = vmatpush.msra.mxu1 %v26_v4  ;;  %v22_v7 = vld [vmem:[#allocation2] sm:$0xff] }
   0x9   :  { %95 = vmatmul.msk.f32.vlgmr.msra.gmra.mxu0 %vm19_vm0, %v24_v5  ;;  %96 = vmatmul.msk.f32.vlgmr.msra.gmra.mxu1 %vm19_vm0, %v25_v6  ;;  %v23_v8 = vld [vmem:[#allocation2 + $0x8] sm:$0xff] }
  0x86   :  { %v54_v9 = vpop.f32.mrf.mxu0  ;;  %v57_v10 = vpop.f32.mrf.mxu1 }
  0x87   :  { %v60_v11 = vadd.f32 %v54_v9, %v22_v7  ;;  %v61_v12 = vadd.f32 %v57_v10, %v23_v8 }
  0x89   :  { %62 = vst.msk [vmem:[#allocation2] sm:$0xff] %vm19_vm0, %v60_v11 }
  0x8a   :  { %63 = vst.msk [vmem:[#allocation2 + $0x8] sm:$0xff] %vm19_vm0, %v61_v12 }
  0x90   :  { %v67_v14 = vld [vmem:[#allocation2] sm:$0xff] }
  0x91   :  { %v73_v15 = vadd.f32 %v105_v13, %v67_v14  ;;  %v68_v16 = vld [vmem:[#allocation2 + $0x8] sm:$0xff] }
  0x92   :  { %v74_v17 = vadd.f32 %v105_v13, %v68_v16 }
  0x93   :  { %75 = vst.msk [vmem:[#allocation2] sm:$0xff] %vm19_vm0, %v73_v15 }
  0x94   :  { %76 = vst.msk [vmem:[#allocation2 + $0x8] sm:$0xff] %vm19_vm0, %v74_v17 }
  0x95   :  { %89 = dma.vmem_to_hbm [thread:$0]  %s82_s25, 256, %s84_s28, [#allocation3], %s134_s29, %s134_s29, %s135_s30  }
  0x96   :  { %130 = dma.done.wait [#allocation3], 256  }
  0x97   :  { %131 = vsyncadd [#allocation3], 4294967040 }
  0x98   :  { %94 = vsyncpa [#allocation3], 1 }

// kernel: self_attention_forward.8
= control target key start
LH: loop header
LB: loop body
LE: loop exit
PB: predicated region body
PF: predicated region fallthrough
CT: control target
= control target key end

     0   :  { %s803_s15 = smov 0   ;;  %s805_s16 = smov 0   ;;  %s881_s0 = inlined_call_operand.vmem [shape: f32[2,4,8,8], index: 0, kind: input, shape index: {}]   ;;  %s882_s1 = inlined_call_operand.vmem [shape: f32[2,4,8,8], index: 1, kind: input, shape index: {}]   ;;  %s883_s2 = inlined_call_operand.vmem [shape: f32[2,4,8,8], index: 2, kind: input, shape index: {}]   ;;  %s884_s3 = inlined_call_operand.vmem [shape: f32[1,1,8,8], index: 3, kind: input, shape index: {}]   ;;  %s885_s4 = inlined_call_operand.vmem [shape: f32[2,4,8,8], index: 4, kind: output, shape index: {}]  }
   0x1   :  { %s807_s17 = smov 0   ;;  %s809_s18 = smov 0  }
   0x2   :  { %s811_s19 = smov 0  }
   0x3 LB: > { %s36_s20 = sadd.s32 1, %s765_s17  ;;  %s40_s21 = sadd.s32 1, %s769_s18  ;;  %s773_s19 = sphi %s811_s19, %s14_s19   ;;  %s769_s18 = sphi %s809_s18, %s889_s18   ;;  %s765_s17 = sphi %s807_s17, %s888_s17   ;;  %s761_s16 = sphi %s805_s16, %s887_s16   ;;  %s757_s15 = sphi %s803_s15, %s886_s15  }
   0x4   : > { %p38_p0 = scmp.ge.s32.totalorder %s36_s20, 4  ;;  %p669_p1 = scmp.ge.s32.totalorder %s773_s19, 1 }
   0x5   : > { %p256_p2 = scmp.lt.s32.totalorder %s773_s19, 9 }
   0x6   : > { %s891_s20 = smov (%p38_p0, %s36_s20), 0  ;;  %s893_s21 = smov (!%p38_p0, %s40_s21), %s769_s18 }
   0x7   : > { %p257_p3 = pnand %p669_p1, %p256_p2  ;;  %p42_p4 = scmp.ge.s32.totalorder %s893_s21, 2 }
   0x8   : > { %p323_p5 = scmp.lt.s32.totalorder (!%p257_p3), %s761_s16, 1  ;;  %p325_p6 = scmp.lt.s32.totalorder (!%p257_p3), %s757_s15, 3 }
   0x9   : > { %s895_s21 = smov (%p42_p4, %s893_s21), 0  ;;  %260 = sbr.rel (%p257_p3) target bundleno = 634 (0x27a), region = 36 }
   0xe   : > { %s897_s16 = smov (!%p323_p5, %s761_s16), 1  ;;  %s899_s15 = smov (!%p325_p6, %s757_s15), 3  ;;  %vm381_vm0 = vcmask 64512   ;;  %vm378_vm1 = vcmask 7168   ;;  %v775_v3 = vmov -inf   ;;  %v386_v4 = vld [vmem:[%s884_s3] sm:$0xff] }
   0xf   : > { %s670_s22 = sshll.u32 %s897_s16, 2  ;;  %379 = vst.msk [vmem:[#allocation2] sm:$0xff] %vm378_vm1, %v775_v3  ;;  %v776_v8 = vmov 0   ;;  %v777_v9 = vmov 0.0  }
  0x10   : > { %s331_s23 = sadd.s32 %s670_s22, %s899_s15  ;;  %726 = vset.pattern.permute.xlu0 %v776_v8  ;;  %727 = vset.pattern.permute.xlu1 %v776_v8  ;;  %380 = vst.msk [vmem:[#allocation3] sm:$0xff] %vm378_vm1, %v777_v9 }
  0x11   : > { %s833_s24 = sshll.u32 %s331_s23, 3  ;;  %728 = vset.pattern.permute.xlu2 %v776_v8  ;;  %382 = vst.msk [vmem:[#allocation4] sm:$0xff] %vm381_vm0, %v777_v9 }
  0x12   : > { %s344_s27 = scalar_lea.vmem %s882_s1, %s833_s24  ;;  %s333_s30 = scalar_lea.vmem %s881_s0, %s833_s24 }
  0x13   : > { %v384_v0 = vld [vmem:[%s344_s27] sm:$0xff]  ;;  %s355_s9 = scalar_lea.vmem %s883_s2, %s833_s24  ;;  %s373_s12 = scalar_lea.vmem %s885_s4, %s833_s24 }
  0x14   : > { %v383_v1 = vld [vmem:[%s333_s30] sm:$0xff]  ;;  %678 = vmatpush.xpose.msk.msra.mxu0 %vm381_vm0, %v384_v0 }
  0x15   : > { %v387_v2 = vmul.f32 0.17677669, %v383_v1  ;;  %v385_v14 = vld [vmem:[%s355_s9] sm:$0xff] }
  0x16   : > { %v415_v10 = vld [vmem:[#allocation2] sm:$0xff]  ;;  %464 = vmatpush.msra.mxu1 %v385_v14 }
  0x17   : > { %679 = vmatmul.msk.f32.vlgmr.msra.gmra.mxu0 %vm381_vm0, %v387_v2  ;;  %v431_v22 = vld [vmem:[#allocation3] sm:$0xff] }
  0x18   : > { %v439_v31 = vld [vmem:[#allocation4] sm:$0xff] }
  0x94   : > { %v412_v5 = vpop.f32.mrf.mxu0 }
  0x95   : > { %v413_v6 = vadd.f32 %v412_v5, %v386_v4 }
  0x97   : > { %v416_v7 = vsel %vm381_vm0, %v413_v6, -inf }
  0x98   : > { %417 = vmax.xlane.f32.xlu0 %v416_v7 }
 0x10b   : > { %v418_v11 = vpop.xlane.xlu0 %417 }
 0x10c   : > { %v419_v12 = vmax.f32 %v415_v10, %v418_v11 }
 0x10e   : > { %v420_v13 = vsub.f32 %v415_v10, %v419_v12  ;;  %471 = vst.msk [vmem:[#allocation2] sm:$0xff] %vm378_vm1, %v419_v12  ;;  %425 = vperm.xlu0 %726, %v419_v12  }
 0x110   : > { %v421_v20 = vmul.f32 1.442695, %v420_v13 }
 0x180   : > { %v426_v15 = vpop.permute.xlu0 %425 }
 0x181   : > { %v428_v16 = vsub.f32 %v413_v6, %v426_v15 }
 0x183   : > { %v429_v17 = vmul.f32 1.442695, %v428_v16 }
 0x185   : > { %729 = vpow2.f32 %v429_v17 }
 0x186   : > { %731 = vpow2.f32 %v421_v20 }
 0x18b   : > { %v730_v18 = vpop.eup %729 }
 0x18c   : > { %680 = vmatmul.msk.f32.vlgmr.msra.gmra.mxu1 %vm381_vm0, %v730_v18  ;;  %v433_v19 = vsel %vm381_vm0, %v730_v18, 0.0  ;;  %v732_v21 = vpop.eup %731 }
 0x18d   : > { %434 = vadd.xlane.f32.xlu1 %v433_v19  ;;  %v432_v23 = vmul.f32 %v732_v21, %v431_v22 }
 0x1a6   : > { %442 = vperm.xlu1 %727, %v732_v21  }
 0x200   : > { %v435_v24 = vpop.xlane.xlu1 %434 }
 0x201   : > { %v436_v25 = vadd.f32 %v435_v24, %v432_v23 }
 0x203   : > { %438 = vst.msk [vmem:[#allocation3] sm:$0xff] %vm378_vm1, %v436_v25 }
 0x209   : > { %v466_v38 = vpop.f32.mrf.mxu1 }
 0x20a   : > { %v475_v26 = vld [vmem:[#allocation3] sm:$0xff] }
 0x20b   : > { %733 = vrcp.f32 %v475_v26  ;;  %v487_v30 = vand.u32 2147483648, %v475_v26  ;;  %v485_v33 = vand.u32 2147483647, %v475_v26  ;;  %vm481_vm3 = vweird.f32 %v475_v26 }
 0x20d   : > { %v488_v37 = vor.u32 1.1754944e-38, %v487_v30  ;;  %vm486_vm5 = vcmp.eq.f32.partialorder %v485_v33, 8.507059e+37 }
 0x211   : > { %v734_v27 = vpop.eup %733 }
 0x212   : > { %v477_v28 = vmul.f32 %v734_v27, %v475_v26  ;;  %vm482_vm2 = vweird.f32 %v734_v27 }
 0x213   : > { %vm483_vm4 = vmor %vm481_vm3, %vm482_vm2 }
 0x214   : > { %v478_v29 = vsub.f32 1.0, %v477_v28 }
 0x216   : > { %v479_v32 = vmul.f32 %v734_v27, %v478_v29 }
 0x218   : > { %v443_v34 = vpop.permute.xlu1 %442  ;;  %v480_v35 = vadd.f32 %v734_v27, %v479_v32 }
 0x219   : > { %v445_v36 = vmul.f32 %v443_v34, %v439_v31 }
 0x21a   : > { %v484_v39 = vsel %vm483_vm4, %v734_v27, %v480_v35 }
 0x21b   : > { %v469_v40 = vadd.f32 %v466_v38, %v445_v36  ;;  %v489_v41 = vsel %vm486_vm5, %v488_v37, %v484_v39 }
 0x21c   : > { %493 = vperm.xlu2 %728, %v489_v41  }
 0x21d   : > { %470 = vst.msk [vmem:[#allocation4] sm:$0xff] %vm381_vm0, %v469_v40 }
 0x224   : > { %v490_v42 = vld [vmem:[#allocation4] sm:$0xff] }
 0x276   : > { %v494_v43 = vpop.permute.xlu2 %493 }
 0x277   : > { %v496_v44 = vmul.f32 %v494_v43, %v490_v42 }
 0x279   : > { %497 = vst.msk [vmem:[%s373_s12] sm:$0xff] %vm381_vm0, %v496_v44 }
 0x27a PF: > { %s14_s19 = sadd.s32 1, %s773_s19   ;;  %s886_s15 = smov %s765_s17 }
 0x27b   : > { %p11_p7 = scmp.ge.s32.totalorder %s14_s19, 10   ;;  %s887_s16 = smov %s769_s18 }
 0x27c   : > { %s888_s17 = smov %s891_s20  ;;  %s889_s18 = smov %s895_s21 }
 0x27d   :  { %13 = sbr.rel (!%p11_p7) target bundleno = 3 (0x3), region = 83 }

</bundles_post_ra>
